<compile_context>
chip_gen: v7x
topology: tpu7x:2x2x1
jax: 0.10.0
libtpu: 0.0.40
codegen_flags: <defaults>
</compile_context>

<pallas_src>
import functools

import jax
import jax.numpy as jnp
from jax.experimental import pallas as pl
from jax.experimental.pallas import tpu as pltpu


# ----------------------------------------------------------------------------
# Kernel
# ----------------------------------------------------------------------------
def _fusion_kernel(t_ref, i_ref, a_ref,      # (TILE_B, D) modality tiles
                   w_att_ref,                # (3, D)   attention weights (resident)
                   b_att_ref,                # (3,)     attention biases (SMEM scalars)
                   wf_ref,                   # (3, D, D) fusion weight row-blocks (resident)
                   bf_ref,                   # (1, D)   fusion bias (resident)
                   o_ref):                   # (TILE_B, D) output tile
    t = t_ref[...]
    im = i_ref[...]
    au = a_ref[...]

    # Attention scores: lane-wise reductions (XLU) + scalar bias from SMEM.
    # (MXU is left free; at small D a degenerate N=1 matmul would waste it.)
    t_s = jnp.sum(t * w_att_ref[0:1, :], axis=-1, keepdims=True) + b_att_ref[0]
    i_s = jnp.sum(im * w_att_ref[1:2, :], axis=-1, keepdims=True) + b_att_ref[1]
    a_s = jnp.sum(au * w_att_ref[2:3, :], axis=-1, keepdims=True) + b_att_ref[2]

    # Gate each modality (sigmoid runs on the EUP slot).
    t_w = jax.nn.sigmoid(t_s) * t
    i_w = jax.nn.sigmoid(i_s) * im
    a_w = jax.nn.sigmoid(a_s) * au

    # Fusion fc (3D -> D): three accumulated MXU dots against the wf
    # row-blocks -- no lane-dim concatenate, no (TILE_B, 3D) intermediate.
    out = jnp.dot(t_w, wf_ref[0], preferred_element_type=jnp.float32)
    out += jnp.dot(i_w, wf_ref[1], preferred_element_type=jnp.float32)
    out += jnp.dot(a_w, wf_ref[2], preferred_element_type=jnp.float32)
    out += bf_ref[...]

    o_ref[...] = jnp.maximum(out, 0.0).astype(o_ref.dtype)


# ----------------------------------------------------------------------------
# Wrapper
# ----------------------------------------------------------------------------
def _round_up(x, m):
    return ((x + m - 1) // m) * m


def _pick_tile_b(B, D, max_tile=512, stream_budget_bytes=24 << 20):
    """Largest power-of-two tile (>=8) whose pipelined streams fit the budget."""
    tile = max_tile
    # 4 pipelined streams (3 inputs + 1 output), double-buffered, f32.
    while tile > 8 and 2 * 4 * tile * D * 4 > stream_budget_bytes:
        tile //= 2
    return max(8, min(tile, _round_up(B, 8)))


def attention_fusion(text, image, audio, packed, *, tile_b=None):
    """packed: dict from pack_params() with keys w_att (3,D), b_att (3,),
    wf (3,D,D), bf (1,D)."""
    B, D = text.shape

    if tile_b is None:
        tile_b = _pick_tile_b(B, D)
    tile_b = max(8, min(_round_up(tile_b, 8), _round_up(B, 8)))

    B_pad = _round_up(B, tile_b)
    if B_pad != B:
        pad = ((0, B_pad - B), (0, 0))
        text = jnp.pad(text, pad)
        image = jnp.pad(image, pad)
        audio = jnp.pad(audio, pad)

    grid = (B_pad // tile_b,)

    # VMEM budget: double-buffered streams + resident weights + headroom.
    itemsize = 4
    stream_bytes = 2 * 4 * tile_b * D * itemsize            # 3 in + 1 out, 2 buffers
    resident_bytes = 2 * (3 * D + 3 * D * D + D) * itemsize  # packed weights/bias
    vmem_bytes = min(stream_bytes + resident_bytes + (8 << 20), 48 << 20)

    tile_spec = pl.BlockSpec((tile_b, D), lambda b: (b, 0))

    out = pl.pallas_call(
        _fusion_kernel,
        out_shape=jax.ShapeDtypeStruct((B_pad, D), jnp.float32),
        grid=grid,
        in_specs=[
            tile_spec,                                            # text tile
            tile_spec,                                            # image tile
            tile_spec,                                            # audio tile
            pl.BlockSpec((3, D), lambda b: (0, 0)),               # attn weights (resident)
            pl.BlockSpec(memory_space=pltpu.MemorySpace.SMEM),    # attn biases (scalars)
            pl.BlockSpec((3, D, D), lambda b: (0, 0, 0)),         # fusion weight blocks
            pl.BlockSpec((1, D), lambda b: (0, 0)),               # fusion bias
        ],
        out_specs=pl.BlockSpec((tile_b, D), lambda b: (b, 0)),
        compiler_params=pltpu.CompilerParams(
            dimension_semantics=("parallel",),
            vmem_limit_bytes=int(vmem_bytes),
        ),
    )(text, image, audio,
      packed["w_att"], packed["b_att"], packed["wf"], packed["bf"])

    return out[:B]


# ----------------------------------------------------------------------------
# Parameters (PyTorch nn.Linear layout) + packing for the kernel
# ----------------------------------------------------------------------------
def init_params(key, D):
    """Deterministic synthetic parameters in PyTorch nn.Linear shapes."""
    ks = jax.random.split(key, 8)
    s_att = 1.0 / (D ** 0.5)
    s_fc = 1.0 / ((3 * D) ** 0.5)
    return {
        "w_text": jax.random.normal(ks[0], (1, D), jnp.float32) * s_att,
        "b_text": jax.random.normal(ks[1], (1,), jnp.float32) * s_att,
        "w_image": jax.random.normal(ks[2], (1, D), jnp.float32) * s_att,
        "b_image": jax.random.normal(ks[3], (1,), jnp.float32) * s_att,
        "w_audio": jax.random.normal(ks[4], (1, D), jnp.float32) * s_att,
        "b_audio": jax.random.normal(ks[5], (1,), jnp.float32) * s_att,
        "w_fc": jax.random.normal(ks[6], (D, 3 * D), jnp.float32) * s_fc,
        "b_fc": jax.random.normal(ks[7], (D,), jnp.float32) * s_fc,
    }


def pack_params(p):
    """Consolidate the 8 tiny PyTorch tensors into 4 kernel-friendly arrays."""
    D = p["w_text"].shape[1]
    w_att = jnp.concatenate([p["w_text"], p["w_image"], p["w_audio"]], axis=0)  # (3, D)
    b_att = jnp.concatenate([p["b_text"], p["b_image"], p["b_audio"]], axis=0)  # (3,)
    # y = fused @ w_fc.T with fused = [t|i|a]; split w_fc.T (3D, D) into 3 row-blocks.
    wf = jnp.transpose(p["w_fc"]).reshape(3, D, D)                              # (3, D, D)
    bf = p["b_fc"].reshape(1, D)                                                # (1, D)
    return {"w_att": w_att, "b_att": b_att, "wf": wf, "bf": bf}


def reference(text, image, audio, p):
    """Pure-JAX reference mirroring the PyTorch forward exactly."""
    tw = jax.nn.sigmoid(text @ p["w_text"].T + p["b_text"])
    iw = jax.nn.sigmoid(image @ p["w_image"].T + p["b_image"])
    aw = jax.nn.sigmoid(audio @ p["w_audio"].T + p["b_audio"])
    fused = jnp.concatenate([tw * text, iw * image, aw * audio], axis=1)
    return jax.nn.relu(fused @ p["w_fc"].T + p["b_fc"])


# ----------------------------------------------------------------------------
# Self-test
# ----------------------------------------------------------------------------
if __name__ == "__main__":
    D = 32  # fusion_output_dim
    key = jax.random.PRNGKey(0)
    k_params, k_data = jax.random.split(key)

    params = init_params(k_params, D)
    packed = pack_params(params)

    # Case 1: tiny batch (single tile).  Case 2: ragged batch exercising the
    # batch grid + tail padding path.
    for B, tile_b in ((8, None), (50, 16)):
        k_data, k_t, k_i, k_a = jax.random.split(k_data, 4)
        text = jax.random.normal(k_t, (B, D), jnp.float32)
        image = jax.random.normal(k_i, (B, D), jnp.float32)
        audio = jax.random.normal(k_a, (B, D), jnp.float32)

        out = attention_fusion(text, image, audio, packed, tile_b=tile_b)
        out = jax.block_until_ready(out)

        ref = reference(text, image, audio, params)
        assert out.shape == (B, D)
        assert jnp.allclose(out, ref, atol=1e-4, rtol=1e-4), \
            f"mismatch vs reference at B={B}"

    print("KERNEL_OK")
</pallas_src>

<mosaic_0001>
module attributes {stable_mosaic.version = 11 : i64} {
  func.func @_fusion_kernel(%arg0: i32, %arg1: memref<8x32xf32, #tpu.memory_space<vmem>>, %arg2: memref<8x32xf32, #tpu.memory_space<vmem>>, %arg3: memref<8x32xf32, #tpu.memory_space<vmem>>, %arg4: memref<3x32xf32, #tpu.memory_space<vmem>>, %arg5: memref<3xf32, #tpu.memory_space<smem>>, %arg6: memref<3x32x32xf32, #tpu.memory_space<vmem>>, %arg7: memref<1x32xf32, #tpu.memory_space<vmem>>, %arg8: memref<8x32xf32, #tpu.memory_space<vmem>>) attributes {dimension_semantics = [#tpu.dimension_semantics<parallel>], iteration_bounds = array<i64: 1>, scalar_prefetch = 0 : i64, scratch_operands = 0 : i64, tpu.core_type = #tpu.core_type<tc>, window_params = [{transform_indices = @transform_0, window_bounds = array<i64: 8, 32>}, {transform_indices = @transform_1, window_bounds = array<i64: 8, 32>}, {transform_indices = @transform_2, window_bounds = array<i64: 8, 32>}, {pipeline_mode = #tpu.pipeline_mode<synchronous>, transform_indices = @transform_3, window_bounds = array<i64: 3, 32>}, {transform_indices = @transform_4, window_bounds = array<i64: 3>}, {pipeline_mode = #tpu.pipeline_mode<synchronous>, transform_indices = @transform_5, window_bounds = array<i64: 3, 32, 32>}, {pipeline_mode = #tpu.pipeline_mode<synchronous>, transform_indices = @transform_6, window_bounds = array<i64: 1, 32>}, {transform_indices = @transform_7, window_bounds = array<i64: 8, 32>}]} {
    %c0 = arith.constant 0 : index
    %c0_0 = arith.constant 0 : index
    %0 = vector.load %arg1[%c0, %c0_0] : memref<8x32xf32, #tpu.memory_space<vmem>>, vector<8x32xf32>
    %c0_1 = arith.constant 0 : index
    %c0_2 = arith.constant 0 : index
    %1 = vector.load %arg2[%c0_1, %c0_2] : memref<8x32xf32, #tpu.memory_space<vmem>>, vector<8x32xf32>
    %c0_3 = arith.constant 0 : index
    %c0_4 = arith.constant 0 : index
    %2 = vector.load %arg3[%c0_3, %c0_4] : memref<8x32xf32, #tpu.memory_space<vmem>>, vector<8x32xf32>
    %c0_5 = arith.constant 0 : index
    %c0_6 = arith.constant 0 : index
    %3 = vector.load %arg4[%c0_5, %c0_6] : memref<3x32xf32, #tpu.memory_space<vmem>>, vector<1x32xf32>
    %4 = vector.broadcast %3 : vector<1x32xf32> to vector<8x32xf32>
    %5 = arith.mulf %0, %4 : vector<8x32xf32>
    %cst = arith.constant dense<0.000000e+00> : vector<8xf32>
    %6 = vector.multi_reduction <add>, %5, %cst [1] : vector<8x32xf32> to vector<8xf32>
    %7 = vector.shape_cast %6 : vector<8xf32> to vector<8x1xf32>
    %c0_7 = arith.constant 0 : index
    %8 = memref.load %arg5[%c0_7] : memref<3xf32, #tpu.memory_space<smem>>
    %9 = vector.broadcast %8 : f32 to vector<8x1xf32>
    %10 = arith.addf %7, %9 : vector<8x1xf32>
    %c1 = arith.constant 1 : index
    %c0_8 = arith.constant 0 : index
    %11 = vector.load %arg4[%c1, %c0_8] : memref<3x32xf32, #tpu.memory_space<vmem>>, vector<1x32xf32>
    %12 = vector.broadcast %11 : vector<1x32xf32> to vector<8x32xf32>
    %13 = arith.mulf %1, %12 : vector<8x32xf32>
    %cst_9 = arith.constant dense<0.000000e+00> : vector<8xf32>
    %14 = vector.multi_reduction <add>, %13, %cst_9 [1] : vector<8x32xf32> to vector<8xf32>
    %15 = vector.shape_cast %14 : vector<8xf32> to vector<8x1xf32>
    %c1_10 = arith.constant 1 : index
    %16 = memref.load %arg5[%c1_10] : memref<3xf32, #tpu.memory_space<smem>>
    %17 = vector.broadcast %16 : f32 to vector<8x1xf32>
    %18 = arith.addf %15, %17 : vector<8x1xf32>
    %c2 = arith.constant 2 : index
    %c0_11 = arith.constant 0 : index
    %19 = vector.load %arg4[%c2, %c0_11] : memref<3x32xf32, #tpu.memory_space<vmem>>, vector<1x32xf32>
    %20 = vector.broadcast %19 : vector<1x32xf32> to vector<8x32xf32>
    %21 = arith.mulf %2, %20 : vector<8x32xf32>
    %cst_12 = arith.constant dense<0.000000e+00> : vector<8xf32>
    %22 = vector.multi_reduction <add>, %21, %cst_12 [1] : vector<8x32xf32> to vector<8xf32>
    %23 = vector.shape_cast %22 : vector<8xf32> to vector<8x1xf32>
    %c2_13 = arith.constant 2 : index
    %24 = memref.load %arg5[%c2_13] : memref<3xf32, #tpu.memory_space<smem>>
    %25 = vector.broadcast %24 : f32 to vector<8x1xf32>
    %26 = arith.addf %23, %25 : vector<8x1xf32>
    %27 = arith.negf %10 : vector<8x1xf32>
    %28 = math.exp %27 : vector<8x1xf32>
    %cst_14 = arith.constant 1.000000e+00 : f32
    %29 = vector.broadcast %cst_14 : f32 to vector<8x1xf32>
    %30 = arith.addf %29, %28 : vector<8x1xf32>
    %31 = arith.divf %29, %30 : vector<8x1xf32>
    %32 = vector.broadcast %31 : vector<8x1xf32> to vector<8x32xf32>
    %33 = arith.mulf %32, %0 : vector<8x32xf32>
    %34 = arith.negf %18 : vector<8x1xf32>
    %35 = math.exp %34 : vector<8x1xf32>
    %cst_15 = arith.constant 1.000000e+00 : f32
    %36 = vector.broadcast %cst_15 : f32 to vector<8x1xf32>
    %37 = arith.addf %36, %35 : vector<8x1xf32>
    %38 = arith.divf %36, %37 : vector<8x1xf32>
    %39 = vector.broadcast %38 : vector<8x1xf32> to vector<8x32xf32>
    %40 = arith.mulf %39, %1 : vector<8x32xf32>
    %41 = arith.negf %26 : vector<8x1xf32>
    %42 = math.exp %41 : vector<8x1xf32>
    %cst_16 = arith.constant 1.000000e+00 : f32
    %43 = vector.broadcast %cst_16 : f32 to vector<8x1xf32>
    %44 = arith.addf %43, %42 : vector<8x1xf32>
    %45 = arith.divf %43, %44 : vector<8x1xf32>
    %46 = vector.broadcast %45 : vector<8x1xf32> to vector<8x32xf32>
    %47 = arith.mulf %46, %2 : vector<8x32xf32>
    %c0_17 = arith.constant 0 : index
    %c0_18 = arith.constant 0 : index
    %c0_19 = arith.constant 0 : index
    %48 = vector.load %arg6[%c0_17, %c0_18, %c0_19] : memref<3x32x32xf32, #tpu.memory_space<vmem>>, vector<1x32x32xf32>
    %49 = vector.shape_cast %48 : vector<1x32x32xf32> to vector<32x32xf32>
    %cst_20 = arith.constant dense<0.000000e+00> : vector<8x32xf32>
    %50 = tpu.matmul %33, %49, %cst_20 {dimension_numbers = #tpu.dot_dimension_numbers<[1], [0], [0], [1], [0, 0, 1, 1], [], []>} : vector<8x32xf32>, vector<32x32xf32>, vector<8x32xf32> -> vector<8x32xf32>
    %c1_21 = arith.constant 1 : index
    %c0_22 = arith.constant 0 : index
    %c0_23 = arith.constant 0 : index
    %51 = vector.load %arg6[%c1_21, %c0_22, %c0_23] : memref<3x32x32xf32, #tpu.memory_space<vmem>>, vector<1x32x32xf32>
    %52 = vector.shape_cast %51 : vector<1x32x32xf32> to vector<32x32xf32>
    %cst_24 = arith.constant dense<0.000000e+00> : vector<8x32xf32>
    %53 = tpu.matmul %40, %52, %cst_24 {dimension_numbers = #tpu.dot_dimension_numbers<[1], [0], [0], [1], [0, 0, 1, 1], [], []>} : vector<8x32xf32>, vector<32x32xf32>, vector<8x32xf32> -> vector<8x32xf32>
    %54 = arith.addf %50, %53 : vector<8x32xf32>
    %c2_25 = arith.constant 2 : index
    %c0_26 = arith.constant 0 : index
    %c0_27 = arith.constant 0 : index
    %55 = vector.load %arg6[%c2_25, %c0_26, %c0_27] : memref<3x32x32xf32, #tpu.memory_space<vmem>>, vector<1x32x32xf32>
    %56 = vector.shape_cast %55 : vector<1x32x32xf32> to vector<32x32xf32>
    %cst_28 = arith.constant dense<0.000000e+00> : vector<8x32xf32>
    %57 = tpu.matmul %47, %56, %cst_28 {dimension_numbers = #tpu.dot_dimension_numbers<[1], [0], [0], [1], [0, 0, 1, 1], [], []>} : vector<8x32xf32>, vector<32x32xf32>, vector<8x32xf32> -> vector<8x32xf32>
    %58 = arith.addf %54, %57 : vector<8x32xf32>
    %c0_29 = arith.constant 0 : index
    %c0_30 = arith.constant 0 : index
    %59 = vector.load %arg7[%c0_29, %c0_30] : memref<1x32xf32, #tpu.memory_space<vmem>>, vector<1x32xf32>
    %60 = vector.broadcast %59 : vector<1x32xf32> to vector<8x32xf32>
    %61 = arith.addf %58, %60 : vector<8x32xf32>
    %cst_31 = arith.constant 0.000000e+00 : f32
    %62 = vector.broadcast %cst_31 : f32 to vector<8x32xf32>
    %63 = arith.maximumf %61, %62 : vector<8x32xf32>
    %c0_32 = arith.constant 0 : index
    %c0_33 = arith.constant 0 : index
    %64 = vector.load %arg8[%c0_32, %c0_33] : memref<8x32xf32, #tpu.memory_space<vmem>>, vector<8x32xf32>
    tpu.vector_store %arg8[%c0_32, %c0_33], %63 {strides = array<i32>} : memref<8x32xf32, #tpu.memory_space<vmem>>, vector<8x32xf32>,
    return
  }
  func.func @transform_0(%arg0: i32) -> (i32, i32) {
    %c0_i32 = arith.constant 0 : i32
    %c0_i32_0 = arith.constant 0 : i32
    return %arg0, %c0_i32 : i32, i32
  }
  func.func @transform_1(%arg0: i32) -> (i32, i32) {
    %c0_i32 = arith.constant 0 : i32
    %c0_i32_0 = arith.constant 0 : i32
    return %arg0, %c0_i32 : i32, i32
  }
  func.func @transform_2(%arg0: i32) -> (i32, i32) {
    %c0_i32 = arith.constant 0 : i32
    %c0_i32_0 = arith.constant 0 : i32
    return %arg0, %c0_i32 : i32, i32
  }
  func.func @transform_3(%arg0: i32) -> (i32, i32) {
    %c0_i32 = arith.constant 0 : i32
    %c0_i32_0 = arith.constant 0 : i32
    %c0_i32_1 = arith.constant 0 : i32
    return %c0_i32, %c0_i32_0 : i32, i32
  }
  func.func @transform_4(%arg0: i32) -> i32 {
    %c0_i32 = arith.constant 0 : i32
    %c0_i32_0 = arith.constant 0 : i32
    return %c0_i32 : i32
  }
  func.func @transform_5(%arg0: i32) -> (i32, i32, i32) {
    %c0_i32 = arith.constant 0 : i32
    %c0_i32_0 = arith.constant 0 : i32
    %c0_i32_1 = arith.constant 0 : i32
    %c0_i32_2 = arith.constant 0 : i32
    return %c0_i32, %c0_i32_0, %c0_i32_1 : i32, i32, i32
  }
  func.func @transform_6(%arg0: i32) -> (i32, i32) {
    %c0_i32 = arith.constant 0 : i32
    %c0_i32_0 = arith.constant 0 : i32
    %c0_i32_1 = arith.constant 0 : i32
    return %c0_i32, %c0_i32_0 : i32, i32
  }
  func.func @transform_7(%arg0: i32) -> (i32, i32) {
    %c0_i32 = arith.constant 0 : i32
    %c0_i32_0 = arith.constant 0 : i32
    return %arg0, %c0_i32 : i32, i32
  }
}

</mosaic_0001>

<bundles_post_ra>
// kernel: tpu_custom_call.1
= control target key start
LH: loop header
LB: loop body
LE: loop exit
PB: predicated region body
PF: predicated region fallthrough
CT: control target
= control target key end

     0   :  { %12 = vsyncpa [#allocation3], 0  ;;  %s799_s0 = inlined_call_operand.hbm [shape: f32[8,32], index: 0, kind: input, shape index: {}]   ;;  %s800_s1 = inlined_call_operand.hbm [shape: f32[8,32], index: 1, kind: input, shape index: {}]   ;;  %s801_s2 = inlined_call_operand.hbm [shape: f32[8,32], index: 2, kind: input, shape index: {}]   ;;  %s802_s3 = inlined_call_operand.vmem [shape: f32[3,32], index: 3, kind: input, shape index: {}]   ;;  %s803_s4 = inlined_call_operand.vmem [shape: f32[3], index: 4, kind: input, shape index: {}]   ;;  %s804_s5 = inlined_call_operand.hbm [shape: f32[3,32,32], index: 5, kind: input, shape index: {}]   ;;  %s805_s6 = inlined_call_operand.vmem [shape: f32[1,32], index: 6, kind: input, shape index: {}]   ;;  %s806_s7 = inlined_call_operand.hbm [shape: f32[8,32], index: 7, kind: output, shape index: {}]  }
   0x1   :  { %13 = vsyncpa [#allocation7], 0 }
   0x2   :  { %14 = vsyncpa [#allocation5], 0 }
   0x3   :  { %15 = vsyncpa [#allocation11], 0 }
   0x4   :  { %16 = vsyncpa [#allocation4], 0  ;;  %s645_s24 = smov [#allocation6]   ;;  %s646_s26 = smov [#allocation2]  }
   0x5   :  { %s33_s25 = sshll.u32 %s645_s24, 4  ;;  %s23_s27 = sshll.u32 %s646_s26, 4  ;;  %s34_s25 = int_to_ptr.vmem [resolvable:$true] %s33_s25  ;;  %s24_s27 = int_to_ptr.vmem [resolvable:$true] %s23_s27 }
   0x6   :  { %s513_s30 = scalar_lea.hbm %s800_s1, 128 }
   0x7   :  { %p514_p0 = scmp.ne.s32.totalorder %s800_s1, %s513_s30  ;;  %p517_p1 = scmp.lt.u32.totalorder %s513_s30, %s800_s1 }
   0x9   :  { %p519_p2 = pnand %p517_p1, %p514_p0 }
   0xb   :  { %522 = shalt.err (!%p519_p2)
}
   0xc   :  { %s523_s12 = scalar_lea.vmem %s34_s25, 128  ;;  %p528_p4 = scmp.lt.s32.totalorder %s34_s25, %s34_s25 }
   0xd   :  { %p524_p3 = scmp.ne.s32.totalorder %s34_s25, %s523_s12  ;;  %p529_p5 = scmp.lt.s32.totalorder %s523_s12, %s523_s12 }
   0xf   :  { %p530_p6 = por %p529_p5, %p528_p4 }
  0x11   :  { %p531_p7 = pnand %p530_p6, %p524_p3 }
  0x13   :  { %534 = shalt.err (!%p531_p7)
}
  0x14   :  { %36 = dma.hbm_to_vmem [thread:$0]  %s800_s1, 128, %s34_s25, [#allocation7]  }
  0x15   :  { %s535_s17 = scalar_lea.hbm %s799_s0, 128 }
  0x16   :  { %p536_p8 = scmp.ne.s32.totalorder %s799_s0, %s535_s17  ;;  %p539_p9 = scmp.lt.u32.totalorder %s535_s17, %s799_s0 }
  0x18   :  { %p541_p10 = pnand %p539_p9, %p536_p8 }
  0x1a   :  { %544 = shalt.err (!%p541_p10)
}
  0x1b   :  { %s545_s22 = scalar_lea.vmem %s24_s27, 128  ;;  %p550_p12 = scmp.lt.s32.totalorder %s24_s27, %s24_s27 }
  0x1c   :  { %p546_p11 = scmp.ne.s32.totalorder %s24_s27, %s545_s22  ;;  %p551_p13 = scmp.lt.s32.totalorder %s545_s22, %s545_s22 }
  0x1e   :  { %p552_p0 = por %p551_p13, %p550_p12 }
  0x20   :  { %p553_p1 = pnand %p552_p0, %p546_p11 }
  0x22   :  { %556 = shalt.err (!%p553_p1)
}
  0x23   :  { %26 = dma.hbm_to_vmem [thread:$0]  %s799_s0, 128, %s24_s27, [#allocation3]  }
  0x24   :  { %s55_s26 = sshll.u32 %s803_s4, 4  ;;  %s647_s28 = smov [#allocation8]   ;;  %s56_s26 = int_to_ptr.vmem [resolvable:$true] %s55_s26 }
  0x25   :  { %s43_s29 = sshll.u32 %s647_s28, 4  ;;  %s557_s9 = scalar_lea.hbm %s801_s2, 128  ;;  %s44_s29 = int_to_ptr.vmem [resolvable:$true] %s43_s29 }
  0x26   :  { %p558_p2 = scmp.ne.s32.totalorder %s801_s2, %s557_s9  ;;  %p561_p3 = scmp.lt.u32.totalorder %s557_s9, %s801_s2 }
  0x28   :  { %p563_p4 = pnand %p561_p3, %p558_p2 }
  0x2a   :  { %566 = shalt.err (!%p563_p4)
}
  0x2b   :  { %s567_s0 = scalar_lea.vmem %s44_s29, 128  ;;  %p572_p6 = scmp.lt.s32.totalorder %s44_s29, %s44_s29 }
  0x2c   :  { %p568_p5 = scmp.ne.s32.totalorder %s44_s29, %s567_s0  ;;  %p573_p7 = scmp.lt.s32.totalorder %s567_s0, %s567_s0 }
  0x2e   :  { %p574_p8 = por %p573_p7, %p572_p6 }
  0x30   :  { %p575_p9 = pnand %p574_p8, %p568_p5 }
  0x32   :  { %578 = shalt.err (!%p575_p9)
}
  0x33   :  { %46 = dma.hbm_to_vmem [thread:$0]  %s801_s2, 128, %s44_s29, [#allocation7]  }
  0x34   :  { %s579_s14 = scalar_lea.vmem %s56_s26, 16  ;;  %p584_p11 = scmp.lt.s32.totalorder %s56_s26, %s56_s26 }
  0x35   :  { %p580_p10 = scmp.ne.s32.totalorder %s56_s26, %s579_s14  ;;  %p585_p12 = scmp.lt.s32.totalorder %s579_s14, %s579_s14 }
  0x37   :  { %p586_p13 = por %p585_p12, %p584_p11 }
  0x39   :  { %p587_p0 = pnand %p586_p13, %p580_p10 }
  0x3b   :  { %590 = shalt.err (!%p587_p0)
}
  0x3c   :  { %s648_s15 = smov [#allocation9]   ;;  %s649_s16 = smov [#allocation10]  }
  0x3d   :  { %58 = dma.vmem_to_smem %s56_s26, 16, %s648_s15, [#allocation5]  }
  0x3e   :  { %s64_s17 = sshll.u32 %s649_s16, 4  ;;  %s591_s20 = scalar_lea.hbm %s804_s5, 1536  ;;  %s65_s17 = int_to_ptr.vmem [resolvable:$true] %s64_s17 }
  0x3f   :  { %p592_p1 = scmp.ne.s32.totalorder %s804_s5, %s591_s20  ;;  %p595_p2 = scmp.lt.u32.totalorder %s591_s20, %s804_s5 }
  0x41   :  { %p597_p3 = pnand %p595_p2, %p592_p1 }
  0x43   :  { %600 = shalt.err (!%p597_p3)
}
  0x44   :  { %s601_s23 = scalar_lea.vmem %s65_s17, 1536  ;;  %p606_p5 = scmp.lt.s32.totalorder %s65_s17, %s65_s17 }
  0x45   :  { %p602_p4 = scmp.ne.s32.totalorder %s65_s17, %s601_s23  ;;  %p607_p6 = scmp.lt.s32.totalorder %s601_s23, %s601_s23 }
  0x47   :  { %p608_p7 = por %p607_p6, %p606_p5 }
  0x49   :  { %p609_p8 = pnand %p608_p7, %p602_p4 }
  0x4b   :  { %612 = shalt.err (!%p609_p8)
}
  0x4c   :  { %s650_s24 = smov 128   ;;  %s651_s25 = smov 8  }
  0x4d   :  { %70 = dma.hbm_to_vmem [thread:$0]  %s804_s5, 1536, %s65_s17, [#allocation11], %s650_s24, %s650_s24, %s651_s25  }
  0x4e   :  { %635 = dma.done.wait [#allocation3], 128  }
  0x4f   :  { %636 = vsyncadd [#allocation3], 4294967168 }
  0x50   :  { %637 = dma.done.wait [#allocation7], 256  }
  0x51   :  { %638 = vsyncadd [#allocation7], 4294967040 }
  0x52   :  { %639 = dma.done.wait [#allocation5], 16  }
  0x53   :  { %640 = vsyncadd [#allocation5], 4294967280 }
  0x54   :  { %641 = dma.done.wait [#allocation11], 1536  }
  0x55   :  { %642 = vsyncadd [#allocation11], 4294965760 }
  0x56   :  { %88 = sfence }
  0x57   :  { %v747_v0 = vld [vmem:[#allocation6] sm:$0xff]  ;;  %vm98_vm0 = vcmask 261120   ;;  %v413_v1 = vld [vmem:[%s802_s3 + $0x1] ss:$0 sm:$0xff]  ;;  %v412_v4 = vld [vmem:[%s802_s3] ss:$0 sm:$0xff] }
  0x58   :  { %v752_v2 = vld [vmem:[#allocation2] sm:$0xff]  ;;  %v110_v3 = vmul.f32 %v413_v1, %v747_v0  ;;  %v758_v5 = vld [vmem:[#allocation8] sm:$0xff]  ;;  %v155_v12 = vld [vmem:[#allocation10 + $0x20] sm:$0xff]  ;;  %v652_v15 = vmov 0.0|0.0   ;;  %vm653_vm1 = vmmov 0   ;;  %v654_v21 = vmov 0.0  }
  0x59   :  { %v415_v6 = vld [vmem:[%s802_s3 + $0x2] ss:$0 sm:$0xff]  ;;  %v97_v7 = vmul.f32 %v412_v4, %v752_v2  ;;  %472 = vmatprep.subr.bf16.mxu0 %v652_v15  ;;  %v157_v16 = vld [vmem:[#allocation10 + $0x30] sm:$0xff]  ;;  %v158_v17 = vld [vmem:[#allocation10 + $0x38] sm:$0xff]  ;;  %478 = vmatprep.subr.bf16.mxu1 %v652_v15  ;;  %s414_s3 = sld [smem:[#allocation9 + $0x1]]  ;;  %s416_s11 = sld [smem:[#allocation9 + $0x2]] }
  0x5a   :  { %v122_v8 = vmul.f32 %v415_v6, %v758_v5  ;;  %v111_v9 = vsel %vm98_vm0, %v110_v3, 0.0  ;;  %v156_v13 = vld [vmem:[#allocation10 + $0x28] sm:$0xff]  ;;  %v150_v18 = vld [vmem:[#allocation10] sm:$0xff]  ;;  %v476_v19 = vpack.c.bf16 %v158_v17, %v157_v16  ;;  %447 = vmatprep.mubr.msk.f32.mxu0 %vm653_vm1, %v654_v21  ;;  %458 = vmatprep.mubr.msk.f32.mxu1 %vm653_vm1, %v654_v21  ;;  %v152_v23 = vld [vmem:[#allocation10 + $0x10] sm:$0xff]  ;;  %s102_s12 = sld [smem:[#allocation9]]  ;;  %s655_s4 = smov [#allocation12]  }
  0x5b   :  { %112 = vadd.xlane.f32.xlu0 %v111_v9  ;;  %v99_v11 = vsel %vm98_vm0, %v97_v7, 0.0  ;;  %v473_v14 = vpack.c.bf16 %v156_v13, %v155_v12  ;;  %v151_v20 = vld [vmem:[#allocation10 + $0x8] sm:$0xff]  ;;  %v153_v24 = vld [vmem:[#allocation10 + $0x18] sm:$0xff]  ;;  %v306_v44 = vld [vmem:[#allocation10 + $0x40] sm:$0xff]  ;;  %s400_s27 = sshll.u32 %s655_s4, 4  ;;  %s401_s27 = int_to_ptr.vmem [resolvable:$true] %s400_s27 }
  0x5c   :  { %v123_v10 = vsel %vm98_vm0, %v122_v8, 0.0  ;;  %v479_v22 = vpack.c.bf16 %v151_v20, %v150_v18  ;;  %v482_v25 = vpack.c.bf16 %v153_v24, %v152_v23  ;;  %v307_v45 = vld [vmem:[#allocation10 + $0x48] sm:$0xff]  ;;  %v308_v49 = vld [vmem:[#allocation10 + $0x50] sm:$0xff]  ;;  %v309_v50 = vld [vmem:[#allocation10 + $0x58] sm:$0xff]  ;;  %s613_s14 = scalar_lea.vmem %s401_s27, 128  ;;  %p618_p10 = scmp.lt.s32.totalorder %s401_s27, %s401_s27 }
  0x5d   :  { %124 = vadd.xlane.f32.xlu1 %v123_v10  ;;  %474 = vmatpush3.bf16.msra.mxu0 %v473_v14  ;;  %v485_v47 = vpack.c.bf16 %v307_v45, %v306_v44  ;;  %v488_v53 = vpack.c.bf16 %v309_v50, %v308_v49  ;;  %v423_v62 = vld [vmem:[%s805_s6] ss:$0 sm:$0xff]  ;;  %p614_p9 = scmp.ne.s32.totalorder %s401_s27, %s613_s14  ;;  %p619_p11 = scmp.lt.s32.totalorder %s613_s14, %s613_s14 }
  0x5e   :  { %475 = vmatprep.subr.bf16.mxu0 %v652_v15  ;;  %480 = vmatpush3.bf16.msra.mxu1 %v479_v22 }
  0x5f   :  { %100 = vadd.xlane.f32.xlu0 %v99_v11  ;;  %481 = vmatprep.subr.bf16.mxu1 %v652_v15  ;;  %v115_v26 = vstv %s414_s3  ;;  %v127_v27 = vstv %s416_s11  ;;  %p620_p12 = por %p619_p11, %p618_p10 }
  0x60   :  { %v103_v31 = vstv %s102_s12 }
  0x61   :  { %477 = vmatpush3.bf16.msra.mxu0 %v476_v19  ;;  %p621_p13 = pnand %p620_p12, %p614_p9 }
  0x62   :  { %484 = vmatprep.subr.bf16.mxu0 %v652_v15  ;;  %483 = vmatpush3.bf16.msra.mxu1 %v482_v25 }
  0xe8   :  { %v113_v28 = vpop.xlane.xlu0 %112 }
  0xe9   :  { %v116_v29 = vadd.f32 %v115_v26, %v113_v28 }
  0xea   :  { %v125_v30 = vpop.xlane.xlu1 %124 }
  0xeb   :  { %v128_v32 = vadd.f32 %v127_v27, %v125_v30  ;;  %v418_v33 = vmul.f32 -1.442695, %v116_v29 }
  0xec   :  { %v101_v34 = vpop.xlane.xlu0 %100 }
  0xed   :  { %v419_v35 = vmul.f32 -1.442695, %v128_v32  ;;  %501 = vpow2.f32 %v418_v33  ;;  %v104_v36 = vadd.f32 %v103_v31, %v101_v34 }
  0xef   :  { %503 = vpow2.f32 %v419_v35  ;;  %v417_v37 = vmul.f32 -1.442695, %v104_v36 }
  0xf1   :  { %505 = vpow2.f32 %v417_v37 }
  0xf7   :  { %v502_v38 = vpop.eup %501 }
  0xf8   :  { %v139_v40 = vadd.f32 1.0, %v502_v38 }
  0xf9   :  { %v504_v39 = vpop.eup %503 }
  0xfa   :  { %v146_v41 = vadd.f32 1.0, %v504_v39  ;;  %507 = vrcp.f32 %v139_v40 }
  0xfb   :  { %v506_v42 = vpop.eup %505 }
  0xfc   :  { %v132_v43 = vadd.f32 1.0, %v506_v42  ;;  %509 = vrcp.f32 %v146_v41 }
  0xfe   :  { %511 = vrcp.f32 %v132_v43 }
 0x104   :  { %v508_v46 = vpop.eup %507 }
 0x105   :  { %v142_v48 = vmul.f32 %v508_v46, %v747_v0 }
 0x106   :  { %v510_v51 = vpop.eup %509 }
 0x107   :  { %448 = vmatmul.mubr.msk.f32.vlgmr.msra.gmra.mrb[0].mxu0 %vm98_vm0, %v142_v48  ;;  %v149_v55 = vmul.f32 %v510_v51, %v758_v5 }
 0x108   :  { %v512_v52 = vpop.eup %511  ;;  %486 = vmatpush3.bf16.msra.mxu0 %v485_v47  ;;  %469 = vmatprep.mubr.msk.f32.mxu0 %vm653_vm1, %v654_v21 }
 0x109   :  { %487 = vmatprep.subr.bf16.mxu0 %v652_v15  ;;  %v135_v54 = vmul.f32 %v512_v52, %v752_v2 }
 0x10b   :  { %459 = vmatmul.mubr.msk.f32.vlgmr.msra.gmra.mrb[0].mxu1 %vm98_vm0, %v135_v54 }
 0x10c   :  { %489 = vmatpush3.bf16.msra.mxu0 %v488_v53 }
 0x10f   :  { %470 = vmatmul.mubr.msk.f32.vlgmr.msra.gmra.mrb[2].mxu0 %vm98_vm0, %v149_v55 }
 0x1da   :  { %v228_v56 = vpop.f32.mrb[0].mxu0 }
 0x1db   :  { %v449_v57 = vpop.f32.mrb[1].mxu0 }
 0x1de   :  { %v301_v58 = vpop.f32.mrb[0].mxu1 }
 0x1df   :  { %v302_v59 = vadd.f32 %v301_v58, %v228_v56  ;;  %v460_v60 = vpop.f32.mrb[1].mxu1 }
 0x1e2   :  { %v379_v61 = vpop.f32.mrb[2].mxu0 }
 0x1e3   :  { %v383_v63 = vadd.f32 %v379_v61, %v302_v59  ;;  %v471_v0 = vpop.f32.mrb[3].mxu0 }
 0x1e5   :  { %v391_v1 = vadd.f32 %v423_v62, %v383_v63 }
 0x1e7   :  { %v392_v2 = vmax.f32 %v391_v1, 0.0 }
 0x1e9   :  { %393 = vst.msk [vmem:[#allocation12] sm:$0xff] %vm98_vm0, %v392_v2 }
 0x1ea   :  { %624 = shalt.err (!%p621_p13)
}
 0x1eb   :  { %s625_s6 = scalar_lea.hbm %s806_s7, 128 }
 0x1ec   :  { %p626_p0 = scmp.ne.s32.totalorder %s806_s7, %s625_s6  ;;  %p629_p1 = scmp.lt.u32.totalorder %s625_s6, %s806_s7 }
 0x1ee   :  { %p631_p2 = pnand %p629_p1, %p626_p0 }
 0x1f0   :  { %634 = shalt.err (!%p631_p2)
}
 0x1f1   :  { %403 = dma.vmem_to_hbm [thread:$0]  %s401_s27, 128, %s806_s7, [#allocation4]  }
 0x1f2   :  { %643 = dma.done.wait [#allocation4], 128  }
 0x1f3   :  { %644 = vsyncadd [#allocation4], 4294967168 }
 0x1f4   :  { %407 = vsyncpa [#allocation3], 1 }
 0x1f5   :  { %408 = vsyncpa [#allocation7], 1 }
 0x1f6   :  { %409 = vsyncpa [#allocation11], 1 }
 0x1f7   :  { %410 = vsyncpa [#allocation4], 1 }
 0x1f8   :  { %411 = vsyncpa [#allocation5], 1 }

</bundles_post_ra>
